<compile_context>
chip_gen: v5e
topology: v5e:2x2
jax: 0.10.0
libtpu: 0.0.40
codegen_flags: <defaults>
</compile_context>

<pallas_src>
import functools

import jax
import jax.numpy as jnp
from jax.experimental import pallas as pl
from jax.experimental.pallas import tpu as pltpu


def _ce_token_loss_kernel(logits_ref, labels_ref, out_ref, *,
                          label_smoothing, ignore_index):
    """Masked, label-smoothed per-token CE loss for one row tile.

    logits_ref: (T, V) float (any float dtype; cast to f32 in-kernel)
    labels_ref: (T, 1) int32
    out_ref   : (T, 1) float32  -- per-token loss, 0 at ignore_index positions
    """
    logits = logits_ref[...].astype(jnp.float32)           # (T, V)
    labels = labels_ref[...]                                # (T, 1) int32
    T, V = logits.shape

    # log-partition:  logZ = m + log(sum(exp(x - m)))
    m = jnp.max(logits, axis=-1, keepdims=True)             # (T, 1)
    sumexp = jnp.sum(jnp.exp(logits - m), axis=-1, keepdims=True)
    log_z = m + jnp.log(sumexp)                              # (T, 1)

    # target logit via compare+select (no dynamic gather on TPU)
    vocab_ids = jax.lax.broadcasted_iota(jnp.int32, (T, V), 1)
    logit_tgt = jnp.sum(
        jnp.where(vocab_ids == labels, logits, 0.0), axis=-1, keepdims=True
    )                                                        # (T, 1)
    mean_logit = jnp.sum(logits, axis=-1, keepdims=True) * jnp.float32(1.0 / V)

    # (1-ls)*nll + ls*mean_k(-logp_k)
    #   = (1-ls)*(logZ - logit_tgt) + ls*(logZ - mean(logits))
    #   = logZ - [(1-ls)*logit_tgt + ls*mean(logits)]
    ls = jnp.float32(label_smoothing)
    loss = log_z - ((1.0 - ls) * logit_tgt + ls * mean_logit)

    valid = labels != jnp.int32(ignore_index)                # (T, 1) bool
    out_ref[...] = jnp.where(valid, loss, 0.0)


def _round_up(x, m):
    return ((x + m - 1) // m) * m


def _pick_tile_rows(num_rows, vocab, target_f32_bytes=3 * 1024 * 1024):
    """Row-tile size: ~3 MiB f32 working tile, multiple of 16 (bf16-legal)."""
    max_rows = max(16, target_f32_bytes // (vocab * 4))
    tile = min(max_rows, _round_up(num_rows, 16))
    return max(16, (tile // 16) * 16)


def compute_ce_loss_pallas(logits, labels, *, ignore_index, label_smoothing,
                           tile_rows=None):
    """Pallas-backed equivalent of SMILESLoss.compute_ce_loss.

    logits: (B, S, V) float32 or bfloat16
    labels: (B, S) integer
    """
    B, S, V = logits.shape
    R = B * S
    itemsize = jnp.dtype(logits.dtype).itemsize

    logits2 = logits.reshape(R, V)
    labels2 = labels.reshape(R).astype(jnp.int32)

    if tile_rows is None:
        tile_r = _pick_tile_rows(R, V)
    else:
        tile_r = max(16, (int(tile_rows) // 16) * 16)
    r_pad = _round_up(R, tile_r)
    if r_pad != R:
        logits2 = jnp.pad(logits2, ((0, r_pad - R), (0, 0)))
        labels2 = jnp.pad(labels2, ((0, r_pad - R),), constant_values=ignore_index)
    labels2 = labels2.reshape(r_pad, 1)

    num_tiles = r_pad // tile_r
    kernel = functools.partial(
        _ce_token_loss_kernel,
        label_smoothing=label_smoothing,
        ignore_index=ignore_index,
    )

    per_token = pl.pallas_call(
        kernel,
        out_shape=jax.ShapeDtypeStruct((r_pad, 1), jnp.float32),
        grid_spec=pltpu.PrefetchScalarGridSpec(
            num_scalar_prefetch=0,
            grid=(num_tiles,),
            in_specs=[
                pl.BlockSpec((tile_r, V), lambda r: (r, 0)),
                pl.BlockSpec((tile_r, 1), lambda r: (r, 0)),
            ],
            out_specs=pl.BlockSpec((tile_r, 1), lambda r: (r, 0)),
        ),
        compiler_params=pltpu.CompilerParams(
            dimension_semantics=("parallel",),
            vmem_limit_bytes=32 * 1024 * 1024,
        ),
        cost_estimate=pl.CostEstimate(
            flops=6 * r_pad * V,
            transcendentals=r_pad * V,
            bytes_accessed=r_pad * V * itemsize + r_pad * 4 + r_pad * 4,
        ),
    )(logits2, labels2)

    # Cheap O(B*S) reductions in plain JAX (matches PyTorch reference exactly).
    per_token = per_token[:R, 0].reshape(B, S)                # already masked
    mask = (labels != ignore_index).astype(jnp.float32)       # (B, S)
    row_loss = jnp.sum(per_token, axis=1) / jnp.maximum(jnp.sum(mask, axis=1), 1e-8)
    return jnp.mean(row_loss)


def smiles_loss_forward(
    logits,
    label,
    previous_validity,
    previous_similarity,
    *,
    ignore_index,
    alpha=0.1,
    beta=0.1,
    label_smoothing=0.1,
):
    """SMILESLoss.forward with update=False.

    Returns (total_loss, ce_loss, validity_loss, similarity_loss,
             validity_score, similarity_score) matching the PyTorch module.
    """
    ce_loss = compute_ce_loss_pallas(
        logits, label, ignore_index=ignore_index, label_smoothing=label_smoothing
    )
    # TODO(synk): update=True path (chemical_losses) needs RDKit; no Pallas equivalent.
    validity_loss = previous_validity
    similarity_loss = previous_similarity
    validity_score = 0.0
    similarity_score = 0.0
    total_loss = ce_loss + alpha * validity_loss + beta * similarity_loss
    return (
        total_loss,
        ce_loss,
        validity_loss,
        similarity_loss,
        validity_score,
        similarity_score,
    )


def _reference_ce_loss(logits, labels, *, ignore_index, label_smoothing):
    """Pure-JAX reference of PyTorch CE(label_smoothing, ignore_index, 'none') + masked means."""
    logp = jax.nn.log_softmax(logits.astype(jnp.float32), axis=-1)
    B, S, V = logits.shape
    one_hot = jax.nn.one_hot(labels, V, dtype=jnp.float32)
    nll = -jnp.sum(one_hot * logp, axis=-1)
    smooth = -jnp.mean(logp, axis=-1)
    per_token = (1.0 - label_smoothing) * nll + label_smoothing * smooth
    mask = (labels != ignore_index).astype(jnp.float32)
    per_token = per_token * mask
    row = jnp.sum(per_token, axis=1) / jnp.maximum(jnp.sum(mask, axis=1), 1e-8)
    return jnp.mean(row)


if __name__ == "__main__":
    # Small shapes consistent with (batch_size, seq_len, vocab_size) logits.
    B, S, V = 4, 8, 128
    IGNORE_INDEX = 0          # padding token id
    LABEL_SMOOTHING = 0.1
    ALPHA, BETA = 0.1, 0.1    # initial_alpha / initial_beta

    key = jax.random.PRNGKey(0)
    k_logits, k_label, k_pad = jax.random.split(key, 3)

    logits = jax.random.normal(k_logits, (B, S, V), dtype=jnp.float32)
    label = jax.random.randint(k_label, (B, S), 0, V, dtype=jnp.int32)
    # force some padding (ignore_index) positions at the tail of each sequence
    pad_len = jax.random.randint(k_pad, (B,), 0, 3)
    pos = jnp.arange(S)[None, :]
    label = jnp.where(pos >= (S - pad_len[:, None]), IGNORE_INDEX, label)

    previous_validity = jnp.float32(0.7)
    previous_similarity = jnp.float32(0.4)

    outs = smiles_loss_forward(
        logits,
        label,
        previous_validity,
        previous_similarity,
        ignore_index=IGNORE_INDEX,
        alpha=ALPHA,
        beta=BETA,
        label_smoothing=LABEL_SMOOTHING,
    )
    outs = jax.block_until_ready(outs)
    total_loss, ce_loss, validity_loss, similarity_loss, v_score, s_score = outs

    # sanity check against pure-JAX reference
    ref_ce = _reference_ce_loss(
        logits, label, ignore_index=IGNORE_INDEX, label_smoothing=LABEL_SMOOTHING
    )
    ref_total = ref_ce + ALPHA * previous_validity + BETA * previous_similarity
    assert jnp.allclose(ce_loss, ref_ce, atol=1e-5, rtol=1e-5), (ce_loss, ref_ce)
    assert jnp.allclose(total_loss, ref_total, atol=1e-5, rtol=1e-5)

    # also exercise a bf16 logits path (kernel casts to f32 internally)
    ce_bf16 = compute_ce_loss_pallas(
        logits.astype(jnp.bfloat16), label,
        ignore_index=IGNORE_INDEX, label_smoothing=LABEL_SMOOTHING,
    )
    ce_bf16 = jax.block_until_ready(ce_bf16)
    assert jnp.allclose(ce_bf16, ref_ce, atol=3e-2, rtol=3e-2), (ce_bf16, ref_ce)

    # exercise multi-tile grid + row padding path (R=30 -> pad to 32, tile_r=16)
    B2, S2, V2 = 3, 10, 96
    k2a, k2b = jax.random.split(jax.random.PRNGKey(1))
    logits2 = jax.random.normal(k2a, (B2, S2, V2), dtype=jnp.float32)
    label2 = jax.random.randint(k2b, (B2, S2), 0, V2, dtype=jnp.int32)
    label2 = label2.at[:, -2:].set(IGNORE_INDEX)
    ce_multi = compute_ce_loss_pallas(
        logits2, label2, ignore_index=IGNORE_INDEX,
        label_smoothing=LABEL_SMOOTHING, tile_rows=16,
    )
    ce_multi = jax.block_until_ready(ce_multi)
    ref_multi = _reference_ce_loss(
        logits2, label2, ignore_index=IGNORE_INDEX, label_smoothing=LABEL_SMOOTHING
    )
    assert jnp.allclose(ce_multi, ref_multi, atol=1e-5, rtol=1e-5), (ce_multi, ref_multi)

    print("KERNEL_OK")
</pallas_src>

<mosaic_0001>
module attributes {stable_mosaic.version = 11 : i64} {
  func.func @_ce_token_loss_kernel(%arg0: i32, %arg1: memref<32x128xf32, #tpu.memory_space<vmem>>, %arg2: memref<32x1xi32, #tpu.memory_space<vmem>>, %arg3: memref<32x1xf32, #tpu.memory_space<vmem>>) attributes {dimension_semantics = [#tpu.dimension_semantics<parallel>], iteration_bounds = array<i64: 1>, scalar_prefetch = 0 : i64, scratch_operands = 0 : i64, tpu.core_type = #tpu.core_type<tc>, window_params = [{transform_indices = @transform_0, window_bounds = array<i64: 32, 128>}, {transform_indices = @transform_1, window_bounds = array<i64: 32, 1>}, {transform_indices = @transform_2, window_bounds = array<i64: 32, 1>}]} {
    %c0 = arith.constant 0 : index
    %c0_0 = arith.constant 0 : index
    %0 = vector.load %arg1[%c0, %c0_0] : memref<32x128xf32, #tpu.memory_space<vmem>>, vector<32x128xf32>
    %c0_1 = arith.constant 0 : index
    %c0_2 = arith.constant 0 : index
    %1 = vector.load %arg2[%c0_1, %c0_2] : memref<32x1xi32, #tpu.memory_space<vmem>>, vector<32x1xi32>
    %cst = arith.constant dense<0xFF800000> : vector<32xf32>
    %2 = vector.multi_reduction <maximumf>, %0, %cst [1] : vector<32x128xf32> to vector<32xf32>
    %3 = vector.shape_cast %2 : vector<32xf32> to vector<32x1xf32>
    %4 = vector.broadcast %3 : vector<32x1xf32> to vector<32x128xf32>
    %5 = arith.subf %0, %4 : vector<32x128xf32>
    %6 = math.exp %5 : vector<32x128xf32>
    %cst_3 = arith.constant dense<0.000000e+00> : vector<32xf32>
    %7 = vector.multi_reduction <add>, %6, %cst_3 [1] : vector<32x128xf32> to vector<32xf32>
    %8 = vector.shape_cast %7 : vector<32xf32> to vector<32x1xf32>
    %9 = math.log %8 : vector<32x1xf32>
    %10 = arith.addf %3, %9 : vector<32x1xf32>
    %11 = tpu.iota {dimensions = array<i32: 1>} : vector<32x128xi32>
    %12 = vector.broadcast %1 : vector<32x1xi32> to vector<32x128xi32>
    %13 = arith.cmpi eq, %11, %12 : vector<32x128xi32>
    %cst_4 = arith.constant 0.000000e+00 : f32
    %14 = vector.broadcast %cst_4 : f32 to vector<32x128xf32>
    %15 = arith.select %13, %0, %14 : vector<32x128xi1>, vector<32x128xf32>
    %cst_5 = arith.constant dense<0.000000e+00> : vector<32xf32>
    %16 = vector.multi_reduction <add>, %15, %cst_5 [1] : vector<32x128xf32> to vector<32xf32>
    %17 = vector.shape_cast %16 : vector<32xf32> to vector<32x1xf32>
    %cst_6 = arith.constant dense<0.000000e+00> : vector<32xf32>
    %18 = vector.multi_reduction <add>, %0, %cst_6 [1] : vector<32x128xf32> to vector<32xf32>
    %19 = vector.shape_cast %18 : vector<32xf32> to vector<32x1xf32>
    %cst_7 = arith.constant 7.812500e-03 : f32
    %20 = vector.broadcast %cst_7 : f32 to vector<32x1xf32>
    %21 = arith.mulf %19, %20 : vector<32x1xf32>
    %cst_8 = arith.constant 1.000000e+00 : f32
    %cst_9 = arith.constant 1.000000e-01 : f32
    %22 = arith.subf %cst_8, %cst_9 : f32
    %23 = vector.broadcast %22 : f32 to vector<32x1xf32>
    %24 = arith.mulf %23, %17 : vector<32x1xf32>
    %cst_10 = arith.constant 1.000000e-01 : f32
    %25 = vector.broadcast %cst_10 : f32 to vector<32x1xf32>
    %26 = arith.mulf %25, %21 : vector<32x1xf32>
    %27 = arith.addf %24, %26 : vector<32x1xf32>
    %28 = arith.subf %10, %27 : vector<32x1xf32>
    %c0_i32 = arith.constant 0 : i32
    %29 = vector.broadcast %c0_i32 : i32 to vector<32x1xi32>
    %30 = arith.cmpi ne, %1, %29 : vector<32x1xi32>
    %cst_11 = arith.constant 0.000000e+00 : f32
    %31 = vector.broadcast %cst_11 : f32 to vector<32x1xf32>
    %32 = arith.select %30, %28, %31 : vector<32x1xi1>, vector<32x1xf32>
    %c0_12 = arith.constant 0 : index
    %c0_13 = arith.constant 0 : index
    %33 = vector.load %arg3[%c0_12, %c0_13] : memref<32x1xf32, #tpu.memory_space<vmem>>, vector<32x1xf32>
    tpu.vector_store %arg3[%c0_12, %c0_13], %32 {strides = array<i32>} : memref<32x1xf32, #tpu.memory_space<vmem>>, vector<32x1xf32>,
    return
  }
  func.func @transform_0(%arg0: i32) -> (i32, i32) {
    %c0_i32 = arith.constant 0 : i32
    %c0_i32_0 = arith.constant 0 : i32
    return %arg0, %c0_i32 : i32, i32
  }
  func.func @transform_1(%arg0: i32) -> (i32, i32) {
    %c0_i32 = arith.constant 0 : i32
    %c0_i32_0 = arith.constant 0 : i32
    return %arg0, %c0_i32 : i32, i32
  }
  func.func @transform_2(%arg0: i32) -> (i32, i32) {
    %c0_i32 = arith.constant 0 : i32
    %c0_i32_0 = arith.constant 0 : i32
    return %arg0, %c0_i32 : i32, i32
  }
}

</mosaic_0001>

<bundles_post_ra>
// kernel: tpu_custom_call.1
= control target key start
LH: loop header
LB: loop body
LE: loop exit
PB: predicated region body
PF: predicated region fallthrough
CT: control target
= control target key end

     0   :  { %v154_v2 = vmov 0   ;;  %v59_v9 = vlaneseq  ;;  %vm125_vm5 = vcmask 7168   ;;  %s238_s0 = inlined_call_operand.vmem [shape: f32[32,128], index: 0, kind: input, shape index: {}]   ;;  %s239_s1 = inlined_call_operand.vmem [shape: s32[32,1], index: 1, kind: input, shape index: {}]   ;;  %s240_s2 = inlined_call_operand.vmem [shape: f32[32,1], index: 2, kind: output, shape index: {}]  }
   0x1   :  { %v13_v0 = vld [vmem:[%s238_s0 + $0x10] sm:$0xff]  ;;  %v11_v1 = vld [vmem:[%s238_s0] sm:$0xff]  ;;  %135 = vset.pattern.permute.xlu2 %v154_v2  ;;  %136 = vset.pattern.permute.xlu0 %v154_v2  ;;  %v14_v4 = vld [vmem:[%s238_s0 + $0x18] sm:$0xff] }
   0x2   :  { %23 = vmax.xlane.f32.xlu1 %v13_v0  ;;  %19 = vmax.xlane.f32.xlu0 %v11_v1  ;;  %v179_v3 = vld [vmem:[%s239_s1] sm:$0xff]  ;;  %v12_v5 = vld [vmem:[%s238_s0 + $0x8] sm:$0xff]  ;;  %v197_v7 = vld [vmem:[%s239_s1 + $0x10] sm:$0xff]  ;;  %v60_v10 = vand.u32 127, %v59_v9 }
   0x3   :  { %62 = vperm.xlu2 %135, %v179_v3   ;;  %137 = vset.pattern.permute.xlu1 %v154_v2  ;;  %v191_v6 = vld [vmem:[%s239_s1 + $0x8] sm:$0xff]  ;;  %v203_v8 = vld [vmem:[%s239_s1 + $0x18] sm:$0xff]  ;;  %vm117_vm4 = vcmp.ne.s32.totalorder %v179_v3, 0  ;;  %vm119_vm7 = vcmp.ne.s32.totalorder %v197_v7, 0 }
   0x4   :  { %vm118_vm6 = vcmp.ne.s32.totalorder %v191_v6, 0  ;;  %vm120_vm8 = vcmp.ne.s32.totalorder %v203_v8, 0 }
   0xa   :  { %25 = vmax.xlane.f32.xlu1 %v14_v4  ;;  %21 = vmax.xlane.f32.xlu0 %v12_v5 }
   0xb   :  { %65 = vperm.xlu2 %135, %v191_v6  }
  0x1e   :  { %68 = vperm.xlu0 %136, %v197_v7  }
  0x23   :  { %71 = vperm.xlu1 %137, %v203_v8  }
  0x34   :  { %89 = vadd.xlane.f32.xlu2 %v11_v1 }
  0x3c   :  { %91 = vadd.xlane.f32.xlu2 %v12_v5 }
  0x44   :  { %93 = vadd.xlane.f32.xlu2 %v13_v0 }
  0x4d   :  { %95 = vadd.xlane.f32.xlu1 %v14_v4 }
  0x5d   :  { %v63_v11 = vpop.permute.xlu2 %62 }
  0x5e   :  { %vm73_vm0 = vcmp.eq.s32.totalorder %v60_v10, %v63_v11 }
  0x5f   :  { %v77_v12 = vsel %vm73_vm0, %v11_v1, 0.0 }
  0x60   :  { %81 = vadd.xlane.f32.xlu2 %v77_v12 }
  0x65   :  { %v66_v29 = vpop.permute.xlu2 %65 }
  0x66   :  { %vm74_vm1 = vcmp.eq.s32.totalorder %v60_v10, %v66_v29 }
  0x67   :  { %v78_v31 = vsel %vm74_vm1, %v12_v5, 0.0 }
  0x75   :  { %v206_v13 = vpop.xlane.xlu1 %23  ;;  %v20_v14 = vpop.xlane.xlu0 %19 }
  0x76   :  { %v29_v15 = vsub.f32 %v13_v0, %v206_v13  ;;  %v27_v16 = vsub.f32 %v11_v1, %v20_v14 }
  0x78   :  { %v35_v17 = vmul.f32 1.442695, %v29_v15  ;;  %v31_v18 = vmul.f32 1.442695, %v27_v16 }
  0x7a   :  { %138 = vpow2.f32 %v35_v17 }
  0x7b   :  { %140 = vpow2.f32 %v31_v18 }
  0x7d   :  { %v209_v19 = vpop.xlane.xlu1 %25  ;;  %v211_v20 = vpop.xlane.xlu0 %21 }
  0x7e   :  { %v30_v21 = vsub.f32 %v14_v4, %v209_v19  ;;  %v28_v22 = vsub.f32 %v12_v5, %v211_v20 }
  0x80   :  { %v139_v23 = vpop.eup %138  ;;  %v37_v24 = vmul.f32 1.442695, %v30_v21  ;;  %v33_v25 = vmul.f32 1.442695, %v28_v22 }
  0x81   :  { %v141_v26 = vpop.eup %140  ;;  %43 = vadd.xlane.f32.xlu0 %v139_v23 }
  0x82   :  { %142 = vpow2.f32 %v37_v24  ;;  %39 = vadd.xlane.f32.xlu2 %v141_v26 }
  0x83   :  { %144 = vpow2.f32 %v33_v25 }
  0x88   :  { %v143_v27 = vpop.eup %142 }
  0x89   :  { %v145_v28 = vpop.eup %144 }
  0x8a   :  { %41 = vadd.xlane.f32.xlu1 %v145_v28  ;;  %45 = vadd.xlane.f32.xlu2 %v143_v27 }
  0x90   :  { %v69_v30 = vpop.permute.xlu0 %68 }
  0x91   :  { %vm75_vm2 = vcmp.eq.s32.totalorder %v60_v10, %v69_v30 }
  0x92   :  { %83 = vadd.xlane.f32.xlu1 %v78_v31  ;;  %v79_v32 = vsel %vm75_vm2, %v13_v0, 0.0 }
  0x93   :  { %85 = vadd.xlane.f32.xlu2 %v79_v32 }
  0x95   :  { %v72_v33 = vpop.permute.xlu1 %71 }
  0x96   :  { %vm76_vm3 = vcmp.eq.s32.totalorder %v60_v10, %v72_v33 }
  0x97   :  { %v80_v34 = vsel %vm76_vm3, %v14_v4, 0.0 }
  0x98   :  { %87 = vadd.xlane.f32.xlu0 %v80_v34 }
  0xa7   :  { %v90_v35 = vpop.xlane.xlu2 %89 }
  0xa8   :  { %v97_v41 = vmul.f32 0.0078125, %v90_v35 }
  0xaa   :  { %v105_v43 = vmul.f32 0.1, %v97_v41 }
  0xaf   :  { %v92_v36 = vpop.xlane.xlu2 %91 }
  0xb0   :  { %v98_v53 = vmul.f32 0.0078125, %v92_v36 }
  0xb2   :  { %v106_v60 = vmul.f32 0.1, %v98_v53 }
  0xb7   :  { %v94_v37 = vpop.xlane.xlu2 %93 }
  0xb8   :  { %v99_v54 = vmul.f32 0.0078125, %v94_v37 }
  0xba   :  { %v107_v0 = vmul.f32 0.1, %v99_v54 }
  0xc0   :  { %v96_v39 = vpop.xlane.xlu1 %95 }
  0xc1   :  { %v100_v3 = vmul.f32 0.0078125, %v96_v39 }
  0xc3   :  { %v108_v15 = vmul.f32 0.1, %v100_v3 }
  0xd3   :  { %v82_v38 = vpop.xlane.xlu2 %81 }
  0xd4   :  { %v101_v44 = vmul.f32 0.9, %v82_v38 }
  0xd6   :  { %v109_v49 = vadd.f32 %v105_v43, %v101_v44 }
  0xf4   :  { %v44_v42 = vpop.xlane.xlu0 %43 }
  0xf5   :  { %v40_v40 = vpop.xlane.xlu2 %39 }
  0xf6   :  { %146 = vlog2.f32 %v40_v40 }
  0xf7   :  { %148 = vlog2.f32 %v44_v42 }
  0xfc   :  { %v147_v45 = vpop.eup %146 }
  0xfd   :  { %v48_v46 = vmul.f32 0.6931472, %v147_v45  ;;  %v42_v47 = vpop.xlane.xlu1 %41  ;;  %v46_v48 = vpop.xlane.xlu2 %45 }
  0xfe   :  { %150 = vlog2.f32 %v42_v47  ;;  %v149_v52 = vpop.eup %148 }
  0xff   :  { %v55_v50 = vadd.f32 %v48_v46, %v20_v14  ;;  %152 = vlog2.f32 %v46_v48  ;;  %v52_v57 = vmul.f32 0.6931472, %v149_v52 }
 0x101   :  { %v113_v51 = vsub.f32 %v55_v50, %v109_v49  ;;  %v57_v5 = vadd.f32 %v52_v57, %v206_v13 }
 0x103   :  { %v121_v55 = vsel %vm117_vm4, %v113_v51, 0.0 }
 0x104   :  { %v151_v56 = vpop.eup %150  ;;  %126 = vst.msk [vmem:[%s240_s2] sm:$0xff] %vm125_vm5, %v121_v55 }
 0x105   :  { %v50_v58 = vmul.f32 0.6931472, %v151_v56  ;;  %v84_v59 = vpop.xlane.xlu1 %83  ;;  %v153_v63 = vpop.eup %152 }
 0x106   :  { %v102_v61 = vmul.f32 0.9, %v84_v59  ;;  %v86_v62 = vpop.xlane.xlu2 %85  ;;  %v54_v10 = vmul.f32 0.6931472, %v153_v63 }
 0x107   :  { %v56_v1 = vadd.f32 %v50_v58, %v211_v20  ;;  %v103_v2 = vmul.f32 0.9, %v86_v62 }
 0x108   :  { %v110_v4 = vadd.f32 %v106_v60, %v102_v61  ;;  %v58_v6 = vadd.f32 %v54_v10, %v209_v19 }
 0x109   :  { %v111_v9 = vadd.f32 %v107_v0, %v103_v2 }
 0x10a   :  { %v114_v11 = vsub.f32 %v56_v1, %v110_v4 }
 0x10b   :  { %v115_v12 = vsub.f32 %v57_v5, %v111_v9  ;;  %v88_v14 = vpop.xlane.xlu0 %87 }
 0x10c   :  { %v122_v16 = vsel %vm118_vm6, %v114_v11, 0.0  ;;  %v104_v17 = vmul.f32 0.9, %v88_v14 }
 0x10d   :  { %127 = vst.msk [vmem:[%s240_s2 + $0x8] sm:$0xff] %vm125_vm5, %v122_v16  ;;  %v123_v18 = vsel %vm119_vm7, %v115_v12, 0.0 }
 0x10e   :  { %128 = vst.msk [vmem:[%s240_s2 + $0x10] sm:$0xff] %vm125_vm5, %v123_v18  ;;  %v112_v7 = vadd.f32 %v108_v15, %v104_v17 }
 0x110   :  { %v116_v13 = vsub.f32 %v58_v6, %v112_v7 }
 0x112   :  { %v124_v20 = vsel %vm120_vm8, %v116_v13, 0.0 }
 0x113   :  { %129 = vst.msk [vmem:[%s240_s2 + $0x18] sm:$0xff] %vm125_vm5, %v124_v20 }

</bundles_post_ra>
